<compile_context>
chip_gen: v7x
topology: tpu7x:2x2x1
jax: 0.10.0
libtpu: 0.0.40
codegen_flags: <defaults>
</compile_context>

<pallas_src>
import jax
import jax.numpy as jnp
from jax.experimental import pallas as pl
from jax.experimental.pallas import tpu as pltpu


def _spatial_conv_kernel(x_ref, adj_ref, wab_ref, bd_ref, wapp_ref, bapp_ref, o_ref):
    # x:   [1, C, FN]   node feats of all frames of one batch element (lane dim = FN)
    # adj: [1, FN, FN]  symmetric 0/1 block-diagonal adjacency (bf16 on the wire)
    _, C, FN = x_ref.shape
    x = x_ref[0]                                                       # [C, FN]  f32
    adj = adj_ref[0].astype(jnp.float32)                               # [FN, FN]

    # Fused src/dst projection (transposed layout):
    #   [A ; B] = [ (W1+W3) ; (W2-W3) ] @ X
    ab = jnp.dot(wab_ref[...], x, preferred_element_type=jnp.float32)  # [2C, FN]
    a = ab[:C]
    b = ab[C:]

    # msg_{u->v} = p_u + x_u * b_v  with  p = x * (a + b_d)
    p = x * (a + bd_ref[...])                                          # [C, FN]

    # Stack p / x / ones along the SUBLANE axis and contract once against the
    # block-diagonal adjacency (symmetric, so adj == adj.T):
    #   S[:, v] = sum_u adj[v, u] * [p ; x ; 1][:, u]
    # -> S_p, S_x and the in-degree all fall out of one MXU matmul.
    pxo = jnp.concatenate(
        [p, x, jnp.ones((1, FN), jnp.float32)], axis=0)                # [2C+1, FN]
    s = jnp.dot(pxo, adj, preferred_element_type=jnp.float32)          # [2C+1, FN]
    s_p = s[:C]
    s_x = s[C:2 * C]
    deg = s[2 * C:2 * C + 1]                                           # [1, FN] in-degree

    summed = s_p + s_x * b                                             # [C, FN]
    # Zero in-degree nodes keep their input feats (DGL reduce only touches mailboxed
    # nodes); exact division for parity with the torch float32 reference.
    mean = jnp.where(deg > 0.0, summed / jnp.maximum(deg, 1.0), x)     # [C, FN]

    # apply_mod: relu(Linear(C, C)) — already in the output [C, FN] layout.
    out = jnp.dot(wapp_ref[...], mean, preferred_element_type=jnp.float32) + bapp_ref[...]
    o_ref[0] = jnp.maximum(out, 0.0)


@jax.jit
def spatial_conv(Y, infos, dense_w, dense_b, apply_w, apply_b):
    """Y: [B, F, N, N] (only slices 0/1/2 of dim 1 are used, as in graph_update);
       infos: [B, C, F, N]  ->  output [B, C, F, N]."""
    B, C, F, N = infos.shape
    FN = F * N

    # frame -> which Y slice (0 for t==0, 1 for 1<=t<=11, 2 for t>11)
    t = jnp.arange(F)
    y_idx = jnp.where(t == 0, 0, jnp.where(t > 11, 2, 1))
    Ysel = Y[:, y_idx, :, :]                                           # [B, F, N, N]
    # symmetrize (nx.from_numpy_matrix -> undirected graph); 0/1 mask
    adj_f = ((Ysel != 0) | (jnp.swapaxes(Ysel, -1, -2) != 0)).astype(jnp.float32)
    # block-diagonal adjacency per batch element: [B, FN, FN]; bf16 0/1 is exact.
    eye_f = jnp.eye(F, dtype=jnp.float32)
    adj_bd = (adj_f[:, :, :, None, :] * eye_f[None, :, None, :, None]).reshape(B, FN, FN)
    adj_bd = adj_bd.astype(jnp.bfloat16)

    # node feats in native lane-dense layout: [B, C, F*N] — pure reshape, no transpose.
    x = infos.reshape(B, C, FN).astype(jnp.float32)

    # split denseLayer weight [C, 3C] and fuse into the transposed-layout projection.
    w1, w2, w3 = dense_w[:, :C], dense_w[:, C:2 * C], dense_w[:, 2 * C:]
    wab = jnp.concatenate([w1 + w3, w2 - w3], axis=0).astype(jnp.float32)   # [2C, C]
    bd = dense_b.reshape(C, 1).astype(jnp.float32)                          # [C, 1]
    wapp = apply_w.astype(jnp.float32)                                      # [C, C]
    bapp = apply_b.reshape(C, 1).astype(jnp.float32)                        # [C, 1]

    out = pl.pallas_call(
        _spatial_conv_kernel,
        out_shape=jax.ShapeDtypeStruct((B, C, FN), jnp.float32),
        grid_spec=pltpu.PrefetchScalarGridSpec(
            num_scalar_prefetch=0,
            grid=(B,),
            in_specs=[
                pl.BlockSpec((1, C, FN), lambda b: (b, 0, 0)),          # x (lane-dense)
                pl.BlockSpec((1, FN, FN), lambda b: (b, 0, 0)),         # block-diag adjacency
                pl.BlockSpec((2 * C, C), lambda b: (0, 0)),             # fused dense weight
                pl.BlockSpec((C, 1), lambda b: (0, 0)),                 # dense bias (column)
                pl.BlockSpec((C, C), lambda b: (0, 0)),                 # apply weight
                pl.BlockSpec((C, 1), lambda b: (0, 0)),                 # apply bias (column)
            ],
            out_specs=pl.BlockSpec((1, C, FN), lambda b: (b, 0, 0)),    # lane-dense output
        ),
        compiler_params=pltpu.CompilerParams(dimension_semantics=("parallel",)),
    )(x, adj_bd, wab, bd, wapp, bapp)

    # [B, C, F*N] -> [B, C, F, N]: pure metadata reshape.
    return out.reshape(B, C, F, N)


def _reference(Y, infos, dense_w, dense_b, apply_w, apply_b):
    """Pure-JAX reference with the same graph semantics (per-frame einsums)."""
    B, C, F, N = infos.shape
    t = jnp.arange(F)
    y_idx = jnp.where(t == 0, 0, jnp.where(t > 11, 2, 1))
    Ysel = Y[:, y_idx, :, :]
    adj = ((Ysel != 0) | (jnp.swapaxes(Ysel, -1, -2) != 0)).astype(jnp.float32)
    x = jnp.transpose(infos, (0, 2, 3, 1)).astype(jnp.float32)          # [B, F, N, C]
    w1, w2, w3 = dense_w[:, :C], dense_w[:, C:2 * C], dense_w[:, 2 * C:]
    a = jnp.einsum('bfnc,dc->bfnd', x, w1 + w3, precision='highest')
    bm = jnp.einsum('bfnc,dc->bfnd', x, w2 - w3, precision='highest')
    p = x * (a + dense_b)
    s_p = jnp.einsum('bfvu,bfuc->bfvc', adj, p, precision='highest')
    s_x = jnp.einsum('bfvu,bfuc->bfvc', adj, x, precision='highest')
    deg = jnp.sum(adj, axis=-1, keepdims=True)
    summed = s_p + s_x * bm
    mean = jnp.where(deg > 0, summed / jnp.maximum(deg, 1.0), x)
    feats = jnp.maximum(
        jnp.einsum('bfnc,dc->bfnd', mean, apply_w, precision='highest') + apply_b, 0.0)
    return jnp.transpose(feats, (0, 3, 1, 2))                           # [B, C, F, N]


if __name__ == "__main__":
    key = jax.random.PRNGKey(0)
    B, C, F, N = 2, 4, 16, 16   # batch, in_channels, frames, num_nodes
    k1, k2, k3, k4, k5, k6, k7 = jax.random.split(key, 7)

    # sparse-ish admittance matrix Y: [B, F, N, N] (only indices 0/1/2 of dim 1 are used)
    Yv = jax.random.normal(k1, (B, F, N, N), dtype=jnp.float32)
    Y = jnp.where(jax.random.uniform(k2, (B, F, N, N)) > 0.6, Yv, 0.0)

    infos = jax.random.normal(k3, (B, C, F, N), dtype=jnp.float32)

    # deterministic parameter init (denseLayer: Linear(3C, C), apply_mod: Linear(C, C))
    dense_w = 0.1 * jax.random.normal(k4, (C, 3 * C), dtype=jnp.float32)
    dense_b = 0.1 * jax.random.normal(k5, (C,), dtype=jnp.float32)
    apply_w = 0.1 * jax.random.normal(k6, (C, C), dtype=jnp.float32)
    apply_b = 0.1 * jax.random.normal(k7, (C,), dtype=jnp.float32)

    out = spatial_conv(Y, infos, dense_w, dense_b, apply_w, apply_b)
    jax.block_until_ready(out)
    assert out.shape == (B, C, F, N)

    ref = _reference(Y, infos, dense_w, dense_b, apply_w, apply_b)
    err = float(jnp.max(jnp.abs(out - ref)))
    assert err < 5e-3, f"kernel/reference mismatch: max abs err {err}"

    print("KERNEL_OK")
</pallas_src>

<mosaic_0001>
module attributes {stable_mosaic.version = 11 : i64} {
  func.func @_spatial_conv_kernel(%arg0: i32, %arg1: memref<1x4x256xf32, #tpu.memory_space<vmem>>, %arg2: memref<1x256x256xbf16, #tpu.memory_space<vmem>>, %arg3: memref<8x4xf32, #tpu.memory_space<vmem>>, %arg4: memref<4x1xf32, #tpu.memory_space<vmem>>, %arg5: memref<4x4xf32, #tpu.memory_space<vmem>>, %arg6: memref<4x1xf32, #tpu.memory_space<vmem>>, %arg7: memref<1x4x256xf32, #tpu.memory_space<vmem>>) attributes {dimension_semantics = [#tpu.dimension_semantics<parallel>], iteration_bounds = array<i64: 2>, scalar_prefetch = 0 : i64, scratch_operands = 0 : i64, tpu.core_type = #tpu.core_type<tc>, window_params = [{transform_indices = @transform_0, window_bounds = array<i64: 1, 4, 256>}, {transform_indices = @transform_1, window_bounds = array<i64: 1, 256, 256>}, {pipeline_mode = #tpu.pipeline_mode<synchronous>, transform_indices = @transform_2, window_bounds = array<i64: 8, 4>}, {pipeline_mode = #tpu.pipeline_mode<synchronous>, transform_indices = @transform_3, window_bounds = array<i64: 4, 1>}, {pipeline_mode = #tpu.pipeline_mode<synchronous>, transform_indices = @transform_4, window_bounds = array<i64: 4, 4>}, {pipeline_mode = #tpu.pipeline_mode<synchronous>, transform_indices = @transform_5, window_bounds = array<i64: 4, 1>}, {transform_indices = @transform_6, window_bounds = array<i64: 1, 4, 256>}]} {
    %c0 = arith.constant 0 : index
    %c0_0 = arith.constant 0 : index
    %c0_1 = arith.constant 0 : index
    %0 = vector.load %arg1[%c0, %c0_0, %c0_1] : memref<1x4x256xf32, #tpu.memory_space<vmem>>, vector<1x4x256xf32>
    %1 = vector.shape_cast %0 : vector<1x4x256xf32> to vector<4x256xf32>
    %c0_2 = arith.constant 0 : index
    %c0_3 = arith.constant 0 : index
    %c0_4 = arith.constant 0 : index
    %2 = vector.load %arg2[%c0_2, %c0_3, %c0_4] : memref<1x256x256xbf16, #tpu.memory_space<vmem>>, vector<1x256x256xbf16>
    %3 = vector.shape_cast %2 : vector<1x256x256xbf16> to vector<256x256xbf16>
    %4 = arith.extf %3 : vector<256x256xbf16> to vector<256x256xf32>
    %c0_5 = arith.constant 0 : index
    %c0_6 = arith.constant 0 : index
    %5 = vector.load %arg3[%c0_5, %c0_6] : memref<8x4xf32, #tpu.memory_space<vmem>>, vector<8x4xf32>
    %cst = arith.constant dense<0.000000e+00> : vector<8x256xf32>
    %6 = tpu.matmul %5, %1, %cst {dimension_numbers = #tpu.dot_dimension_numbers<[1], [0], [0], [1], [0, 0, 1, 1], [], []>} : vector<8x4xf32>, vector<4x256xf32>, vector<8x256xf32> -> vector<8x256xf32>
    %7 = vector.extract_strided_slice %6 {offsets = [0, 0], sizes = [4, 256], strides = [1, 1]} : vector<8x256xf32> to vector<4x256xf32>
    %8 = vector.extract_strided_slice %6 {offsets = [4, 0], sizes = [4, 256], strides = [1, 1]} : vector<8x256xf32> to vector<4x256xf32>
    %c0_7 = arith.constant 0 : index
    %c0_8 = arith.constant 0 : index
    %9 = vector.load %arg4[%c0_7, %c0_8] : memref<4x1xf32, #tpu.memory_space<vmem>>, vector<4x1xf32>
    %10 = vector.broadcast %9 : vector<4x1xf32> to vector<4x256xf32>
    %11 = arith.addf %7, %10 : vector<4x256xf32>
    %12 = arith.mulf %1, %11 : vector<4x256xf32>
    %cst_9 = arith.constant 1.000000e+00 : f32
    %13 = vector.broadcast %cst_9 : f32 to vector<1x256xf32>
    %14 = tpu.concatenate %12, %1, %13 in 0 : vector<4x256xf32>, vector<4x256xf32>, vector<1x256xf32> -> vector<9x256xf32>
    %cst_10 = arith.constant dense<0.000000e+00> : vector<9x256xf32>
    %15 = tpu.matmul %14, %4, %cst_10 {dimension_numbers = #tpu.dot_dimension_numbers<[1], [0], [0], [1], [0, 0, 1, 1], [], []>} : vector<9x256xf32>, vector<256x256xf32>, vector<9x256xf32> -> vector<9x256xf32>
    %16 = vector.extract_strided_slice %15 {offsets = [0, 0], sizes = [4, 256], strides = [1, 1]} : vector<9x256xf32> to vector<4x256xf32>
    %17 = vector.extract_strided_slice %15 {offsets = [4, 0], sizes = [4, 256], strides = [1, 1]} : vector<9x256xf32> to vector<4x256xf32>
    %18 = vector.extract_strided_slice %15 {offsets = [8, 0], sizes = [1, 256], strides = [1, 1]} : vector<9x256xf32> to vector<1x256xf32>
    %19 = arith.mulf %17, %8 : vector<4x256xf32>
    %20 = arith.addf %16, %19 : vector<4x256xf32>
    %cst_11 = arith.constant 0.000000e+00 : f32
    %21 = vector.broadcast %cst_11 : f32 to vector<1x256xf32>
    %22 = arith.cmpf ogt, %18, %21 : vector<1x256xf32>
    %cst_12 = arith.constant 1.000000e+00 : f32
    %23 = vector.broadcast %cst_12 : f32 to vector<1x256xf32>
    %24 = arith.maximumf %18, %23 : vector<1x256xf32>
    %25 = vector.broadcast %24 : vector<1x256xf32> to vector<4x256xf32>
    %26 = arith.divf %20, %25 : vector<4x256xf32>
    %27 = vector.shape_cast %22 : vector<1x256xi1> to vector<1x256xi1>
    %28 = vector.broadcast %27 : vector<1x256xi1> to vector<4x256xi1>
    %29 = arith.select %28, %26, %1 : vector<4x256xi1>, vector<4x256xf32>
    %c0_13 = arith.constant 0 : index
    %c0_14 = arith.constant 0 : index
    %30 = vector.load %arg5[%c0_13, %c0_14] : memref<4x4xf32, #tpu.memory_space<vmem>>, vector<4x4xf32>
    %cst_15 = arith.constant dense<0.000000e+00> : vector<4x256xf32>
    %31 = tpu.matmul %30, %29, %cst_15 {dimension_numbers = #tpu.dot_dimension_numbers<[1], [0], [0], [1], [0, 0, 1, 1], [], []>} : vector<4x4xf32>, vector<4x256xf32>, vector<4x256xf32> -> vector<4x256xf32>
    %c0_16 = arith.constant 0 : index
    %c0_17 = arith.constant 0 : index
    %32 = vector.load %arg6[%c0_16, %c0_17] : memref<4x1xf32, #tpu.memory_space<vmem>>, vector<4x1xf32>
    %33 = vector.broadcast %32 : vector<4x1xf32> to vector<4x256xf32>
    %34 = arith.addf %31, %33 : vector<4x256xf32>
    %cst_18 = arith.constant 0.000000e+00 : f32
    %35 = vector.broadcast %cst_18 : f32 to vector<4x256xf32>
    %36 = arith.maximumf %34, %35 : vector<4x256xf32>
    %c0_19 = arith.constant 0 : index
    %c0_20 = arith.constant 0 : index
    %c0_21 = arith.constant 0 : index
    %37 = vector.load %arg7[%c0_19, %c0_20, %c0_21] : memref<1x4x256xf32, #tpu.memory_space<vmem>>, vector<1x4x256xf32>
    %38 = vector.shape_cast %37 : vector<1x4x256xf32> to vector<4x256xf32>
    %39 = vector.shape_cast %36 : vector<4x256xf32> to vector<1x4x256xf32>
    tpu.vector_store %arg7[%c0_19, %c0_20, %c0_21], %39 {strides = array<i32>} : memref<1x4x256xf32, #tpu.memory_space<vmem>>, vector<1x4x256xf32>,
    return
  }
  func.func @transform_0(%arg0: i32) -> (i32, i32, i32) {
    %c0_i32 = arith.constant 0 : i32
    %c0_i32_0 = arith.constant 0 : i32
    %c0_i32_1 = arith.constant 0 : i32
    return %arg0, %c0_i32, %c0_i32_0 : i32, i32, i32
  }
  func.func @transform_1(%arg0: i32) -> (i32, i32, i32) {
    %c0_i32 = arith.constant 0 : i32
    %c0_i32_0 = arith.constant 0 : i32
    %c0_i32_1 = arith.constant 0 : i32
    return %arg0, %c0_i32, %c0_i32_0 : i32, i32, i32
  }
  func.func @transform_2(%arg0: i32) -> (i32, i32) {
    %c0_i32 = arith.constant 0 : i32
    %c0_i32_0 = arith.constant 0 : i32
    %c0_i32_1 = arith.constant 0 : i32
    return %c0_i32, %c0_i32_0 : i32, i32
  }
  func.func @transform_3(%arg0: i32) -> (i32, i32) {
    %c0_i32 = arith.constant 0 : i32
    %c0_i32_0 = arith.constant 0 : i32
    %c0_i32_1 = arith.constant 0 : i32
    return %c0_i32, %c0_i32_0 : i32, i32
  }
  func.func @transform_4(%arg0: i32) -> (i32, i32) {
    %c0_i32 = arith.constant 0 : i32
    %c0_i32_0 = arith.constant 0 : i32
    %c0_i32_1 = arith.constant 0 : i32
    return %c0_i32, %c0_i32_0 : i32, i32
  }
  func.func @transform_5(%arg0: i32) -> (i32, i32) {
    %c0_i32 = arith.constant 0 : i32
    %c0_i32_0 = arith.constant 0 : i32
    %c0_i32_1 = arith.constant 0 : i32
    return %c0_i32, %c0_i32_0 : i32, i32
  }
  func.func @transform_6(%arg0: i32) -> (i32, i32, i32) {
    %c0_i32 = arith.constant 0 : i32
    %c0_i32_0 = arith.constant 0 : i32
    %c0_i32_1 = arith.constant 0 : i32
    return %arg0, %c0_i32, %c0_i32_0 : i32, i32, i32
  }
}

</mosaic_0001>

<bundles_post_ra>
// kernel: spatial_conv.1
= control target key start
LH: loop header
LB: loop body
LE: loop exit
PB: predicated region body
PF: predicated region fallthrough
CT: control target
= control target key end

     0   :  { %s981_s21 = smov 0   ;;  %s1080_s0 = inlined_call_operand.vmem [shape: f32[2,4,256], index: 0, kind: input, shape index: {}]   ;;  %s1081_s1 = inlined_call_operand.vmem [shape: bf16[2,256,256], index: 1, kind: input, shape index: {}]   ;;  %s1082_s2 = inlined_call_operand.vmem [shape: f32[8,4], index: 2, kind: input, shape index: {}]   ;;  %s1083_s3 = inlined_call_operand.vmem [shape: f32[4,1], index: 3, kind: input, shape index: {}]   ;;  %s1084_s4 = inlined_call_operand.vmem [shape: f32[4,4], index: 4, kind: input, shape index: {}]   ;;  %s1085_s5 = inlined_call_operand.vmem [shape: f32[4,1], index: 5, kind: input, shape index: {}]   ;;  %s1086_s6 = inlined_call_operand.vmem [shape: f32[2,4,256], index: 6, kind: output, shape index: {}]  }
   0x1 LB: > { %s751_s22 = sadd.s32 4294967295, %s941_s21   ;;  %p755_p0 = scmp.ge.s32.totalorder %s941_s21, 1  ;;  %s941_s21 = sphi %s981_s21, %s16_s21  }
   0x2   : > { %p222_p1 = scmp.lt.s32.totalorder %s941_s21, 3 }
   0x4   : > { %p223_p2 = pnand %p755_p0, %p222_p1 }
   0x5   : > { %p257_p3 = scmp.lt.s32.totalorder (!%p223_p2), %s751_s22, 1  ;;  %v943_v0 = vmov (!%p223_p2), 0.0   ;;  %v944_v1 = vmov (!%p223_p2), 0   ;;  %v452_v2 = vld [vmem:[%s1083_s3] sm:$0xf] (!%p223_p2)  ;;  %vm376_vm0 = vcmask (!%p223_p2), 1043456   ;;  %v563_v51 = vlaneseq (!%p223_p2) }
   0x6   : > { %226 = sbr.rel (%p223_p2) target bundleno = 701 (0x2bd), region = 44  ;;  %445 = vmatprep.mubr.f32.mxu0 (!%p223_p2), %v943_v0  ;;  %880 = vset.pattern.permute.xlu0 (!%p223_p2), %v944_v1  ;;  %v591_v3 = vld [vmem:[%s1085_s5] sm:$0xf] (!%p223_p2)  ;;  %vm372_vm1 = vcmask (!%p223_p2), 31744   ;;  %v945_v50 = vmov (!%p223_p2), 1.0  }
   0x7   : > { %455 = vperm.xlu0 (!%p223_p2), %880, %v452_v2   ;;  %v369_v8 = vld [vmem:[%s1082_s2] sm:$0xff] (!%p223_p2)  ;;  %v564_v52 = vshrl.u32 (!%p223_p2), %v563_v51, 7 }
   0x9   : > { %v565_v58 = vsub.s32 (!%p223_p2), 0, %v564_v52 }
   0xb   : > { %594 = vperm.xlu0 (!%p223_p2), %880, %v591_v3  }
   0xd   : > { %s1088_s22 = smov (!%p257_p3, %s751_s22), 1 }
   0xe   : > { %s770_s27 = sshll.u32 %s1088_s22, 3  ;;  %s771_s28 = sshll.u32 %s1088_s22, 8 }
   0xf   : > { %s261_s7 = scalar_lea.vmem %s1080_s0, %s770_s27  ;;  %s1008_s10 = scalar_lea.vmem %s1081_s1, %s771_s28 }
  0x10   : > { %v1010_v4 = vld [vmem:[%s261_s7] sm:$0xff]  ;;  %v885_v9 = vld [vmem:[%s1008_s10 + $0x14] ss:$8 sps:$4 sm:$0xff]   ;;  %v887_v10 = vld [vmem:[%s1008_s10 + $0x10] ss:$8 sps:$4 sm:$0xff]   ;;  %s271_s17 = scalar_lea.vmem %s1086_s6, %s770_s27 }
  0x11   : > { %v1014_v5 = vcombine.high %v1010_v4, %v1010_v4  ;;  %v882_v6 = vld [vmem:[%s1008_s10 + $0x4] ss:$8 sps:$4 sm:$0xff]   ;;  %v884_v7 = vld [vmem:[%s1008_s10] ss:$8 sps:$4 sm:$0xff]   ;;  %v891_v13 = vld [vmem:[%s1008_s10 + $0x34] ss:$8 sps:$4 sm:$0xff]   ;;  %v468_v46 = vcombine.low %v1010_v4, %v1010_v4 }
  0x12   : > { %774 = vmatprep.subr.bf16.mxu1 %v882_v6  ;;  %v888_v11 = vld [vmem:[%s1008_s10 + $0x24] ss:$8 sps:$4 sm:$0xff]   ;;  %v890_v12 = vld [vmem:[%s1008_s10 + $0x20] ss:$8 sps:$4 sm:$0xff]   ;;  %v893_v14 = vld [vmem:[%s1008_s10 + $0x30] ss:$8 sps:$4 sm:$0xff]  }
  0x13   : > { %762 = vmatprep.subr.msk.mxu0 %vm376_vm0, %v1014_v5  ;;  %776 = vmatpush1.bf16.msra.mxu1 %v884_v7  ;;  %v894_v15 = vld [vmem:[%s1008_s10 + $0x44] ss:$8 sps:$4 sm:$0xff]   ;;  %v896_v16 = vld [vmem:[%s1008_s10 + $0x40] ss:$8 sps:$4 sm:$0xff]   ;;  %v897_v17 = vld [vmem:[%s1008_s10 + $0x54] ss:$8 sps:$4 sm:$0xff]  }
  0x14   : > { %763 = vmatpush1.msk.msra.mxu0 %vm376_vm0, %v1010_v4  ;;  %778 = vmatprep.subr.bf16.mxu1 %v885_v9  ;;  %v899_v18 = vld [vmem:[%s1008_s10 + $0x50] ss:$8 sps:$4 sm:$0xff]   ;;  %v900_v19 = vld [vmem:[%s1008_s10 + $0x64] ss:$8 sps:$4 sm:$0xff]   ;;  %v902_v20 = vld [vmem:[%s1008_s10 + $0x60] ss:$8 sps:$4 sm:$0xff]  }
  0x15   : > { %764 = vmatmul.mubr.msk.f32.vlgmr.msra.gmra.mrb[0].mxu0 %vm372_vm1, %v369_v8  ;;  %v903_v21 = vld [vmem:[%s1008_s10 + $0x74] ss:$8 sps:$4 sm:$0xff]   ;;  %v905_v22 = vld [vmem:[%s1008_s10 + $0x70] ss:$8 sps:$4 sm:$0xff]   ;;  %v906_v23 = vld [vmem:[%s1008_s10 + $0x84] ss:$8 sps:$4 sm:$0xff]  }
  0x16   : > { %670 = vmatprep.mubr.f32.mxu0 %v943_v0  ;;  %v908_v24 = vld [vmem:[%s1008_s10 + $0x80] ss:$8 sps:$4 sm:$0xff]   ;;  %v909_v25 = vld [vmem:[%s1008_s10 + $0x94] ss:$8 sps:$4 sm:$0xff]   ;;  %v911_v26 = vld [vmem:[%s1008_s10 + $0x90] ss:$8 sps:$4 sm:$0xff]  }
  0x17   : > { %780 = vmatpush1.bf16.msra.mxu1 %v887_v10  ;;  %v912_v27 = vld [vmem:[%s1008_s10 + $0xa4] ss:$8 sps:$4 sm:$0xff]   ;;  %v914_v28 = vld [vmem:[%s1008_s10 + $0xa0] ss:$8 sps:$4 sm:$0xff]   ;;  %v915_v29 = vld [vmem:[%s1008_s10 + $0xb4] ss:$8 sps:$4 sm:$0xff]  }
  0x18   : > { %782 = vmatprep.subr.bf16.mxu1 %v888_v11  ;;  %v917_v30 = vld [vmem:[%s1008_s10 + $0xb0] ss:$8 sps:$4 sm:$0xff]   ;;  %v918_v31 = vld [vmem:[%s1008_s10 + $0xc4] ss:$8 sps:$4 sm:$0xff]   ;;  %v920_v32 = vld [vmem:[%s1008_s10 + $0xc0] ss:$8 sps:$4 sm:$0xff]  }
  0x19   : > { %v921_v33 = vld [vmem:[%s1008_s10 + $0xd4] ss:$8 sps:$4 sm:$0xff]   ;;  %v923_v34 = vld [vmem:[%s1008_s10 + $0xd0] ss:$8 sps:$4 sm:$0xff]   ;;  %v924_v35 = vld [vmem:[%s1008_s10 + $0xe4] ss:$8 sps:$4 sm:$0xff]  }
  0x1a   : > { %v926_v36 = vld [vmem:[%s1008_s10 + $0xe0] ss:$8 sps:$4 sm:$0xff]   ;;  %v927_v37 = vld [vmem:[%s1008_s10 + $0xf4] ss:$8 sps:$4 sm:$0xff]   ;;  %v929_v38 = vld [vmem:[%s1008_s10 + $0xf0] ss:$8 sps:$4 sm:$0xff]  }
  0x1b   : > { %784 = vmatpush1.bf16.msra.mxu1 %v890_v12 }
  0x1c   : > { %786 = vmatprep.subr.bf16.mxu1 %v891_v13 }
  0x1f   : > { %788 = vmatpush1.bf16.msra.mxu1 %v893_v14 }
  0x20   : > { %790 = vmatprep.subr.bf16.mxu1 %v894_v15 }
  0x23   : > { %792 = vmatpush1.bf16.msra.mxu1 %v896_v16 }
  0x24   : > { %794 = vmatprep.subr.bf16.mxu1 %v897_v17  ;;  %v590_v17 = vld [vmem:[%s1084_s4] sm:$0xf] }
  0x27   : > { %796 = vmatpush1.bf16.msra.mxu1 %v899_v18 }
  0x28   : > { %798 = vmatprep.subr.bf16.mxu1 %v900_v19 }
  0x2b   : > { %800 = vmatpush1.bf16.msra.mxu1 %v902_v20 }
  0x2c   : > { %802 = vmatprep.subr.bf16.mxu1 %v903_v21 }
  0x2f   : > { %804 = vmatpush1.bf16.msra.mxu1 %v905_v22 }
  0x30   : > { %806 = vmatprep.subr.bf16.mxu1 %v906_v23 }
  0x33   : > { %808 = vmatpush1.bf16.msra.mxu1 %v908_v24 }
  0x34   : > { %810 = vmatprep.subr.bf16.mxu1 %v909_v25 }
  0x37   : > { %812 = vmatpush1.bf16.msra.mxu1 %v911_v26 }
  0x38   : > { %814 = vmatprep.subr.bf16.mxu1 %v912_v27 }
  0x3b   : > { %816 = vmatpush1.bf16.msra.mxu1 %v914_v28 }
  0x3c   : > { %818 = vmatprep.subr.bf16.mxu1 %v915_v29 }
  0x3f   : > { %820 = vmatpush1.bf16.msra.mxu1 %v917_v30 }
  0x40   : > { %822 = vmatprep.subr.bf16.mxu1 %v918_v31 }
  0x43   : > { %824 = vmatpush1.bf16.msra.mxu1 %v920_v32 }
  0x44   : > { %826 = vmatprep.subr.bf16.mxu1 %v921_v33 }
  0x47   : > { %828 = vmatpush1.bf16.msra.mxu1 %v923_v34 }
  0x48   : > { %830 = vmatprep.subr.bf16.mxu1 %v924_v35 }
  0x4b   : > { %832 = vmatpush1.bf16.msra.mxu1 %v926_v36 }
  0x4c   : > { %834 = vmatprep.subr.bf16.mxu1 %v927_v37 }
  0x4f   : > { %836 = vmatpush1.bf16.msra.mxu1 %v929_v38 }
  0x86   : > { %v456_v39 = vpop.permute.xlu0 %455 }
  0xe8   : > { %v447_v40 = vpop.f32.mrb[0].mxu0 }
  0xe9   : > { %v458_v41 = vadd.f32 %v456_v39, %v447_v40  ;;  %v449_v42 = vpop.f32.mrb[1].mxu0 }
  0xea   : > { %v459_v43 = vadd.f32 %v456_v39, %v449_v42 }
  0xec   : > { %v462_v44 = vcombine.low %v458_v41, %v459_v43 }
  0xee   : > { %v464_v45 = vmul.f32 %v462_v44, %v1010_v4 }
  0xf0   : > { %v466_v47 = vcombine.high %v464_v45, %v464_v45  ;;  %v470_v49 = vsel %vm376_vm0, %v464_v45, %v468_v46 }
  0xf2   : > { %v471_v48 = vsel %vm376_vm0, %v466_v47, %v1010_v4 }
  0xf3   : > { %536 = vmatprep.mubr.f32.mxu1 %v471_v48 }
  0xf4   : > { %537 = vmatmul.mubr.f32.vlgmr.msra.gmra.mrb[0].mxu1 %v470_v49 }
  0xf5   : > { %542 = vmatprep.mubr.f32.mxu1 %v945_v50 }
  0xf8   : > { %543 = vmatmul.mubr.f32.gmra.mrb[2].mxu1 %v945_v50 }
 0x1c7   : > { %v538_v53 = vpop.f32.mrb[0].mxu1 }
 0x1c8   : > { %v549_v54 = vmul.f32 %v538_v53, %v447_v40  ;;  %v540_v55 = vpop.f32.mrb[1].mxu1 }
 0x1c9   : > { %v550_v56 = vmul.f32 %v540_v55, %v449_v42 }
 0x1ca   : > { %v553_v57 = vrot.slane %v549_v54, 4 }
 0x1cb   : > { %v554_v59 = vrot.slane %v550_v56, 4  ;;  %v544_v60 = vpop.f32.mrb[2].mxu1 }
 0x1cc   : > { %v557_v61 = vadd.f32 %v553_v57, %v538_v53  ;;  %v561_v62 = vmax.f32 %v544_v60, 1.0  ;;  %v546_v63 = vpop.f32.mrb[3].mxu1  ;;  %vm559_vm2 = vcmp.gt.f32.partialorder %v544_v60, 0.0 }
 0x1cd   : > { %v558_v0 = vadd.f32 %v554_v59, %v540_v55  ;;  %v562_v2 = vmax.f32 %v546_v63, 1.0  ;;  %vm560_vm3 = vcmp.gt.f32.partialorder %v546_v63, 0.0  ;;  %v575_v7 = vsel %vm559_vm2, 1, %v944_v1 }
 0x1ce   : > { %v566_v3 = vrot.slane %v561_v62, %v565_v58  ;;  %v576_v8 = vsel %vm560_vm3, 1, %v944_v1  ;;  %v580_v9 = vrot.slane %v575_v7, %v565_v58  ;;  %v595_v1 = vpop.permute.xlu0 %594 }
 0x1cf   : > { %v570_v6 = vrot.slane %v562_v2, %v565_v58  ;;  %v584_v10 = vrot.slane %v576_v8, %v565_v58 }
 0x1d0   : > { %931 = vrcp.f32 %v566_v3  ;;  %vm585_vm4 = vcmp.eq.s32.totalorder %v580_v9, 1 }
 0x1d1   : > { %933 = vrcp.f32 %v570_v6  ;;  %vm586_vm5 = vcmp.eq.s32.totalorder %v584_v10, 1 }
 0x1da   : > { %v932_v11 = vpop.eup %931 }
 0x1db   : > { %v934_v12 = vpop.eup %933  ;;  %v572_v13 = vmul.f32 %v932_v11, %v557_v61 }
 0x1dc   : > { %v574_v14 = vmul.f32 %v934_v12, %v558_v0 }
 0x1dd   : > { %v588_v15 = vsel %vm585_vm4, %v572_v13, %v1010_v4 }
 0x1de   : > { %v589_v16 = vsel %vm586_vm5, %v574_v14, %v1014_v5 }
 0x1df   : > { %765 = vmatprep.subr.msk.mxu0 %vm376_vm0, %v589_v16 }
 0x1e0   : > { %766 = vmatpush1.msk.msra.mxu0 %vm376_vm0, %v588_v15 }
 0x1e1   : > { %767 = vmatmul.mubr.msk.f32.vlgmr.msra.gmra.mrb[2].mxu0 %vm372_vm1, %v590_v17 }
 0x2b4   : > { %v672_v18 = vpop.f32.mrb[2].mxu0 }
 0x2b5   : > { %v673_v19 = vadd.f32 %v672_v18, %v595_v1  ;;  %v674_v20 = vpop.f32.mrb[3].mxu0 }
 0x2b6   : > { %v675_v21 = vadd.f32 %v674_v20, %v595_v1 }
 0x2b7   : > { %v677_v22 = vmax.f32 %v673_v19, 0.0 }
 0x2b8   : > { %v678_v23 = vmax.f32 %v675_v21, 0.0 }
 0x2ba   : > { %v681_v4 = vcombine.low %v677_v22, %v678_v23 }
 0x2bc   : > { %683 = vst [vmem:[%s271_s17] sm:$0xff] %v681_v4 }
 0x2bd PF: > { %s16_s21 = sadd.s32 1, %s941_s21  }
 0x2be   : > { %p13_p4 = scmp.ge.s32.totalorder %s16_s21, 4  }
 0x2c0   :  { %15 = sbr.rel (!%p13_p4) target bundleno = 1 (0x1), region = 77 }

</bundles_post_ra>
